<compile_context>
chip_gen: v5e
topology: v5e:2x2
jax: 0.10.0
libtpu: 0.0.40
codegen_flags: <defaults>
</compile_context>

<pallas_src>
import jax
import jax.numpy as jnp
from jax import lax
from jax.experimental import pallas as pl
from jax.experimental.pallas import tpu as pltpu

NEG_SLOPE = 0.01   # PyTorch nn.LeakyReLU default
LANE = 128         # TPU vreg lane width


def _leaky_relu(x):
    return jnp.where(x > 0, x, NEG_SLOPE * x)


# --------------------------------------------------------------------------
# Kernel
# --------------------------------------------------------------------------
def attacker_mlp_kernel(x_ref, w1_ref, w2_ref, w3_ref, sp_ref, o_ref):
    """Fused MLP forward for one batch tile.

    x_ref:  (BM, D)   f32 (cast to bf16 in-kernel for the MXU)
    w1_ref: (64, D)   w2_ref: (32, 64)   w3_ref: (16, 32)   compute dtype
    sp_ref: (64, 8)   f32 packed small params:
              col 0: b1 (64)  col 1: b2 (32)  col 2: b3 (16)
              col 3: b4 (1)   col 4: w4^T (16)
    o_ref:  (1, BM)   f32 (batch on the 128-lane axis -> lane-dense store)
    """
    sp = sp_ref[...]                      # (64, 8) f32, loaded once
    b1 = sp[:, 0:1]                       # (64, 1)
    b2 = sp[0:32, 1:2]                    # (32, 1)
    b3 = sp[0:16, 2:3]                    # (16, 1)
    b4 = sp[0:1, 3:4]                     # (1, 1)
    w4 = sp[0:16, 4:5]                    # (16, 1) == W4^T

    cd = w1_ref.dtype                     # MXU compute dtype (bf16)
    x = x_ref[...].astype(cd)             # (BM, D), cast on VPU (free, mem-bound)

    # Layer 1: Linear(D, 64) + LeakyReLU   (Dropout(0.4) identity in eval).
    # dot_general contracts both last dims -> (64, BM); on-chip transpose of x.
    h = lax.dot_general(w1_ref[...], x,
                        dimension_numbers=(((1,), (1,)), ((), ())),
                        preferred_element_type=jnp.float32) + b1
    h = _leaky_relu(h)                    # (64, BM) f32

    # Layer 2: Linear(64, 32) + LeakyReLU  (Dropout(0.3) identity in eval).
    h = jnp.dot(w2_ref[...], h.astype(cd),
                preferred_element_type=jnp.float32) + b2
    h = _leaky_relu(h)                    # (32, BM) f32

    # Layer 3: Linear(32, 16) + LeakyReLU.
    h = jnp.dot(w3_ref[...], h.astype(cd),
                preferred_element_type=jnp.float32) + b3
    h = _leaky_relu(h)                    # (16, BM) f32

    # Layer 4: Linear(16, 1) as VPU broadcast-multiply + sublane (XLU) reduce.
    logits = jnp.sum(h * w4, axis=0, keepdims=True) + b4   # (1, BM) f32
    o_ref[...] = jax.nn.sigmoid(logits).astype(o_ref.dtype)

    # TODO(synk): training-mode dropout (inverted dropout via pltpu.prng_*) is
    # not implemented; this kernel reproduces eval-mode forward semantics.


# --------------------------------------------------------------------------
# Parameter packing (done ONCE, outside the hot path)
# --------------------------------------------------------------------------
def prepare_params(params, compute_dtype=jnp.bfloat16):
    """Pre-cast weights and pack biases + final weight row into (64, 8) f32."""
    (w1, b1), (w2, b2), (w3, b3), (w4, b4) = params
    sp = jnp.zeros((64, 8), jnp.float32)
    sp = sp.at[:64, 0].set(b1)
    sp = sp.at[:32, 1].set(b2)
    sp = sp.at[:16, 2].set(b3)
    sp = sp.at[:1, 3].set(b4)
    sp = sp.at[:16, 4].set(w4[0])         # w4 is (1, 16) PyTorch layout
    return {
        "w1": w1.astype(compute_dtype),   # (64, D)
        "w2": w2.astype(compute_dtype),   # (32, 64)
        "w3": w3.astype(compute_dtype),   # (16, 32)
        "sp": sp,                         # (64, 8) f32
    }


# --------------------------------------------------------------------------
# Block-size policy (generation-aware, VMEM-capped)
# --------------------------------------------------------------------------
def _num_tensorcores():
    """Best-effort TensorCores-per-device (megacore) detection; defaults to 1."""
    try:
        dev = jax.devices()[0]
        kind = (getattr(dev, "device_kind", "") or "").lower()
        if ("v7" in kind) or ("v5p" in kind) or (" v4" in kind) or kind.startswith("tpu v4"):
            return 2
        nc = getattr(dev, "num_cores", None)
        if isinstance(nc, int) and nc > 0:
            return nc
    except Exception:
        pass
    return 1


def _choose_block_m(batch, d, num_cores, x_itemsize):
    """Pick the batch tile: full batch on 1-TC chips, small even split on
    megacore chips, capped so a double-buffered x tile stays ~<=8 MiB."""
    cap = max(LANE, (((8 << 20) // max(1, d * x_itemsize)) // LANE) * LANE)
    if num_cores > 1:
        want = -(-batch // num_cores)            # ceil(batch / num_cores)
        want = -(-want // LANE) * LANE           # round up to lane multiple
    else:
        want = batch
    bm = min(want, cap)
    if bm >= batch:
        return batch                             # single full block
    return max(LANE, (bm // LANE) * LANE)        # multi-step: lane-aligned


# --------------------------------------------------------------------------
# Forward wrapper
# --------------------------------------------------------------------------
def attacker_model_forward(x, prepacked, *, block_m=None, num_cores=None):
    """Fused Pallas forward.  x: [B, D] f32 -> [B, 1] f32 probabilities."""
    B, D = x.shape
    w1c, w2c, w3c, sp = prepacked["w1"], prepacked["w2"], prepacked["w3"], prepacked["sp"]
    assert w1c.shape == (64, D)
    x_itemsize = jnp.dtype(x.dtype).itemsize

    if num_cores is None:
        num_cores = _num_tensorcores()
    if block_m is None:
        block_m = _choose_block_m(B, D, num_cores, x_itemsize)
    else:
        if block_m >= B:
            block_m = B
        else:
            block_m = max(LANE, (-(-block_m // LANE)) * LANE)   # lane-align
    if block_m >= B:
        block_m = B

    grid_m = pl.cdiv(B, block_m)

    def resident_spec(shape):
        return pl.BlockSpec(shape, lambda i: (0, 0))

    # Advisory cost estimate for XLA's scheduler.
    flops = 2 * B * (D * 64 + 64 * 32 + 32 * 16 + 16 * 1)
    weight_bytes = int(w1c.size * 2 + w2c.size * 2 + w3c.size * 2 + sp.size * 4)
    cost = pl.CostEstimate(
        flops=int(flops),
        transcendentals=int(B),
        bytes_accessed=int(B * D * x_itemsize + B * 4 + weight_bytes),
    )

    # Raise the scoped-VMEM limit only if the double-buffered tiles need it.
    est_vmem = 2 * (block_m * D * x_itemsize + block_m * 4) + 2 * weight_bytes + (1 << 20)
    cp_kwargs = dict(dimension_semantics=("parallel",))
    if est_vmem > (12 << 20):
        cp_kwargs["vmem_limit_bytes"] = int(min(est_vmem + (4 << 20), 48 << 20))

    out = pl.pallas_call(
        attacker_mlp_kernel,
        out_shape=jax.ShapeDtypeStruct((1, B), jnp.float32),
        grid_spec=pltpu.PrefetchScalarGridSpec(
            num_scalar_prefetch=0,
            grid=(grid_m,),
            in_specs=[
                pl.BlockSpec((block_m, D), lambda i: (i, 0)),   # x batch tile
                resident_spec(w1c.shape),
                resident_spec(w2c.shape),
                resident_spec(w3c.shape),
                resident_spec(sp.shape),
            ],
            out_specs=pl.BlockSpec((1, block_m), lambda i: (0, i)),
        ),
        compiler_params=pltpu.CompilerParams(**cp_kwargs),
        cost_estimate=cost,
    )(x, w1c, w2c, w3c, sp)

    return out[0].reshape(B, 1)     # keep f32 (matches PyTorch output dtype)


# --------------------------------------------------------------------------
# Parameter init + references
# --------------------------------------------------------------------------
def init_params(key, input_dim):
    """PyTorch nn.Linear defaults (uniform +-1/sqrt(fan_in)); [out, in] layout."""
    dims = [(input_dim, 64), (64, 32), (32, 16), (16, 1)]
    params = []
    for fan_in, fan_out in dims:
        key, kw, kb = jax.random.split(key, 3)
        bound = 1.0 / (float(fan_in) ** 0.5)
        w = jax.random.uniform(kw, (fan_out, fan_in), jnp.float32, -bound, bound)
        b = jax.random.uniform(kb, (fan_out,), jnp.float32, -bound, bound)
        params.append((w, b))
    return params


def reference_forward_f32(x, params):
    """Plain-JAX f32 reference (exact PyTorch eval-mode semantics)."""
    h = x
    for i, (w, b) in enumerate(params):
        h = h @ w.T + b
        if i < 3:
            h = jnp.where(h > 0, h, NEG_SLOPE * h)
    return jax.nn.sigmoid(h)


def reference_forward_mirror(x, params, compute_dtype):
    """Reference mirroring the kernel's precision (bf16 MXU, f32 accumulate)."""
    (w1, b1), (w2, b2), (w3, b3), (w4, b4) = params
    cd = compute_dtype
    h = x.T.astype(jnp.float32)                                    # (D, B)
    h = jnp.dot(w1.astype(cd), h.astype(cd),
                preferred_element_type=jnp.float32) + b1[:, None]
    h = jnp.where(h > 0, h, NEG_SLOPE * h)
    h = jnp.dot(w2.astype(cd), h.astype(cd),
                preferred_element_type=jnp.float32) + b2[:, None]
    h = jnp.where(h > 0, h, NEG_SLOPE * h)
    h = jnp.dot(w3.astype(cd), h.astype(cd),
                preferred_element_type=jnp.float32) + b3[:, None]
    h = jnp.where(h > 0, h, NEG_SLOPE * h)
    logits = jnp.sum(h * w4.T, axis=0, keepdims=True) + b4[:, None]
    return jax.nn.sigmoid(logits).T                                # (B, 1)


if __name__ == "__main__":
    INPUT_DIM = 32

    key = jax.random.PRNGKey(0)
    key, kp = jax.random.split(key)
    params = init_params(kp, INPUT_DIM)
    prepacked = prepare_params(params)          # cast/pack once, off hot path

    # Case 1: auto policy (single step on 1-TC chips, small split on megacore).
    # Case 2: tiny ragged batch (single full block, no padding).
    # Case 3: forced multi-step grid with a partial tail block (cdiv path).
    cases = [
        dict(batch=256, block_m=None),
        dict(batch=20, block_m=None),
        dict(batch=300, block_m=128),
    ]
    for c in cases:
        key, kx = jax.random.split(key)
        x = jax.random.normal(kx, (c["batch"], INPUT_DIM), jnp.float32)

        out = jax.block_until_ready(
            attacker_model_forward(x, prepacked, block_m=c["block_m"]))
        assert out.shape == (c["batch"], 1)
        assert out.dtype == jnp.float32

        ref_mirror = reference_forward_mirror(x, params, jnp.bfloat16)
        ref_f32 = reference_forward_f32(x, params)
        assert jnp.allclose(out, ref_mirror, atol=1e-3, rtol=1e-3), (
            "mismatch vs bf16-mirror reference", c)
        assert jnp.allclose(out, ref_f32, atol=3e-2, rtol=0.0), (
            "mismatch vs f32 reference", c)

    print("KERNEL_OK")
</pallas_src>

<mosaic_0001>
module attributes {stable_mosaic.version = 11 : i64} {
  func.func @attacker_mlp_kernel(%arg0: i32, %arg1: memref<256x32xf32, #tpu.memory_space<vmem>>, %arg2: memref<64x32xbf16, #tpu.memory_space<vmem>>, %arg3: memref<32x64xbf16, #tpu.memory_space<vmem>>, %arg4: memref<16x32xbf16, #tpu.memory_space<vmem>>, %arg5: memref<64x8xf32, #tpu.memory_space<vmem>>, %arg6: memref<1x256xf32, #tpu.memory_space<vmem>>) attributes {dimension_semantics = [#tpu.dimension_semantics<parallel>], iteration_bounds = array<i64: 1>, scalar_prefetch = 0 : i64, scratch_operands = 0 : i64, tpu.core_type = #tpu.core_type<tc>, window_params = [{transform_indices = @transform_0, window_bounds = array<i64: 256, 32>}, {pipeline_mode = #tpu.pipeline_mode<synchronous>, transform_indices = @transform_1, window_bounds = array<i64: 64, 32>}, {pipeline_mode = #tpu.pipeline_mode<synchronous>, transform_indices = @transform_2, window_bounds = array<i64: 32, 64>}, {pipeline_mode = #tpu.pipeline_mode<synchronous>, transform_indices = @transform_3, window_bounds = array<i64: 16, 32>}, {pipeline_mode = #tpu.pipeline_mode<synchronous>, transform_indices = @transform_4, window_bounds = array<i64: 64, 8>}, {transform_indices = @transform_5, window_bounds = array<i64: 1, 256>}]} {
    %c0 = arith.constant 0 : index
    %c0_0 = arith.constant 0 : index
    %0 = vector.load %arg5[%c0, %c0_0] : memref<64x8xf32, #tpu.memory_space<vmem>>, vector<64x8xf32>
    %1 = vector.extract_strided_slice %0 {offsets = [0, 0], sizes = [64, 1], strides = [1, 1]} : vector<64x8xf32> to vector<64x1xf32>
    %2 = vector.extract_strided_slice %0 {offsets = [0, 1], sizes = [32, 1], strides = [1, 1]} : vector<64x8xf32> to vector<32x1xf32>
    %3 = vector.extract_strided_slice %0 {offsets = [0, 2], sizes = [16, 1], strides = [1, 1]} : vector<64x8xf32> to vector<16x1xf32>
    %4 = vector.extract_strided_slice %0 {offsets = [0, 3], sizes = [1, 1], strides = [1, 1]} : vector<64x8xf32> to vector<1x1xf32>
    %5 = vector.extract_strided_slice %0 {offsets = [0, 4], sizes = [16, 1], strides = [1, 1]} : vector<64x8xf32> to vector<16x1xf32>
    %c0_1 = arith.constant 0 : index
    %c0_2 = arith.constant 0 : index
    %6 = vector.load %arg1[%c0_1, %c0_2] : memref<256x32xf32, #tpu.memory_space<vmem>>, vector<256x32xf32>
    %7 = arith.truncf %6 : vector<256x32xf32> to vector<256x32xbf16>
    %c0_3 = arith.constant 0 : index
    %c0_4 = arith.constant 0 : index
    %8 = vector.load %arg2[%c0_3, %c0_4] : memref<64x32xbf16, #tpu.memory_space<vmem>>, vector<64x32xbf16>
    %cst = arith.constant dense<0.000000e+00> : vector<64x256xf32>
    %9 = tpu.matmul %8, %7, %cst {dimension_numbers = #tpu.dot_dimension_numbers<[1], [1], [0], [0], [0, 0, 1, 0], [], []>} : vector<64x32xbf16>, vector<256x32xbf16>, vector<64x256xf32> -> vector<64x256xf32>
    %10 = vector.broadcast %1 : vector<64x1xf32> to vector<64x256xf32>
    %11 = arith.addf %9, %10 : vector<64x256xf32>
    %cst_5 = arith.constant 0.000000e+00 : f32
    %12 = vector.broadcast %cst_5 : f32 to vector<64x256xf32>
    %13 = arith.cmpf ogt, %11, %12 : vector<64x256xf32>
    %cst_6 = arith.constant 0.00999999977 : f32
    %14 = vector.broadcast %cst_6 : f32 to vector<64x256xf32>
    %15 = arith.mulf %14, %11 : vector<64x256xf32>
    %16 = arith.select %13, %11, %15 : vector<64x256xi1>, vector<64x256xf32>
    %c0_7 = arith.constant 0 : index
    %c0_8 = arith.constant 0 : index
    %17 = vector.load %arg3[%c0_7, %c0_8] : memref<32x64xbf16, #tpu.memory_space<vmem>>, vector<32x64xbf16>
    %18 = arith.truncf %16 : vector<64x256xf32> to vector<64x256xbf16>
    %cst_9 = arith.constant dense<0.000000e+00> : vector<32x256xf32>
    %19 = tpu.matmul %17, %18, %cst_9 {dimension_numbers = #tpu.dot_dimension_numbers<[1], [0], [0], [1], [0, 0, 1, 1], [], []>} : vector<32x64xbf16>, vector<64x256xbf16>, vector<32x256xf32> -> vector<32x256xf32>
    %20 = vector.broadcast %2 : vector<32x1xf32> to vector<32x256xf32>
    %21 = arith.addf %19, %20 : vector<32x256xf32>
    %cst_10 = arith.constant 0.000000e+00 : f32
    %22 = vector.broadcast %cst_10 : f32 to vector<32x256xf32>
    %23 = arith.cmpf ogt, %21, %22 : vector<32x256xf32>
    %cst_11 = arith.constant 0.00999999977 : f32
    %24 = vector.broadcast %cst_11 : f32 to vector<32x256xf32>
    %25 = arith.mulf %24, %21 : vector<32x256xf32>
    %26 = arith.select %23, %21, %25 : vector<32x256xi1>, vector<32x256xf32>
    %c0_12 = arith.constant 0 : index
    %c0_13 = arith.constant 0 : index
    %27 = vector.load %arg4[%c0_12, %c0_13] : memref<16x32xbf16, #tpu.memory_space<vmem>>, vector<16x32xbf16>
    %28 = arith.truncf %26 : vector<32x256xf32> to vector<32x256xbf16>
    %cst_14 = arith.constant dense<0.000000e+00> : vector<16x256xf32>
    %29 = tpu.matmul %27, %28, %cst_14 {dimension_numbers = #tpu.dot_dimension_numbers<[1], [0], [0], [1], [0, 0, 1, 1], [], []>} : vector<16x32xbf16>, vector<32x256xbf16>, vector<16x256xf32> -> vector<16x256xf32>
    %30 = vector.broadcast %3 : vector<16x1xf32> to vector<16x256xf32>
    %31 = arith.addf %29, %30 : vector<16x256xf32>
    %cst_15 = arith.constant 0.000000e+00 : f32
    %32 = vector.broadcast %cst_15 : f32 to vector<16x256xf32>
    %33 = arith.cmpf ogt, %31, %32 : vector<16x256xf32>
    %cst_16 = arith.constant 0.00999999977 : f32
    %34 = vector.broadcast %cst_16 : f32 to vector<16x256xf32>
    %35 = arith.mulf %34, %31 : vector<16x256xf32>
    %36 = arith.select %33, %31, %35 : vector<16x256xi1>, vector<16x256xf32>
    %37 = vector.broadcast %5 : vector<16x1xf32> to vector<16x256xf32>
    %38 = arith.mulf %36, %37 : vector<16x256xf32>
    %cst_17 = arith.constant dense<0.000000e+00> : vector<256xf32>
    %39 = vector.multi_reduction <add>, %38, %cst_17 [0] : vector<16x256xf32> to vector<256xf32>
    %40 = vector.shape_cast %39 : vector<256xf32> to vector<1x256xf32>
    %41 = vector.broadcast %4 : vector<1x1xf32> to vector<1x256xf32>
    %42 = arith.addf %40, %41 : vector<1x256xf32>
    %43 = arith.negf %42 : vector<1x256xf32>
    %44 = math.exp %43 : vector<1x256xf32>
    %cst_18 = arith.constant 1.000000e+00 : f32
    %45 = vector.broadcast %cst_18 : f32 to vector<1x256xf32>
    %46 = arith.addf %45, %44 : vector<1x256xf32>
    %47 = arith.divf %45, %46 : vector<1x256xf32>
    %c0_19 = arith.constant 0 : index
    %c0_20 = arith.constant 0 : index
    %48 = vector.load %arg6[%c0_19, %c0_20] : memref<1x256xf32, #tpu.memory_space<vmem>>, vector<1x256xf32>
    tpu.vector_store %arg6[%c0_19, %c0_20], %47 {strides = array<i32>} : memref<1x256xf32, #tpu.memory_space<vmem>>, vector<1x256xf32>,
    return
  }
  func.func @transform_0(%arg0: i32) -> (i32, i32) {
    %c0_i32 = arith.constant 0 : i32
    %c0_i32_0 = arith.constant 0 : i32
    return %arg0, %c0_i32 : i32, i32
  }
  func.func @transform_1(%arg0: i32) -> (i32, i32) {
    %c0_i32 = arith.constant 0 : i32
    %c0_i32_0 = arith.constant 0 : i32
    %c0_i32_1 = arith.constant 0 : i32
    return %c0_i32, %c0_i32_0 : i32, i32
  }
  func.func @transform_2(%arg0: i32) -> (i32, i32) {
    %c0_i32 = arith.constant 0 : i32
    %c0_i32_0 = arith.constant 0 : i32
    %c0_i32_1 = arith.constant 0 : i32
    return %c0_i32, %c0_i32_0 : i32, i32
  }
  func.func @transform_3(%arg0: i32) -> (i32, i32) {
    %c0_i32 = arith.constant 0 : i32
    %c0_i32_0 = arith.constant 0 : i32
    %c0_i32_1 = arith.constant 0 : i32
    return %c0_i32, %c0_i32_0 : i32, i32
  }
  func.func @transform_4(%arg0: i32) -> (i32, i32) {
    %c0_i32 = arith.constant 0 : i32
    %c0_i32_0 = arith.constant 0 : i32
    %c0_i32_1 = arith.constant 0 : i32
    return %c0_i32, %c0_i32_0 : i32, i32
  }
  func.func @transform_5(%arg0: i32) -> (i32, i32) {
    %c0_i32 = arith.constant 0 : i32
    %c0_i32_0 = arith.constant 0 : i32
    return %c0_i32, %arg0 : i32, i32
  }
}

</mosaic_0001>

<bundles_post_ra>
// kernel: tpu_custom_call.1
= control target key start
LH: loop header
LB: loop body
LE: loop exit
PB: predicated region body
PF: predicated region fallthrough
CT: control target
= control target key end

     0   :  { %vm146_vm0 = vcmask 261120   ;;  %s929_s0 = inlined_call_operand.vmem [shape: f32[256,32], index: 0, kind: input, shape index: {}]   ;;  %s930_s1 = inlined_call_operand.vmem [shape: bf16[64,32], index: 1, kind: input, shape index: {}]   ;;  %s931_s2 = inlined_call_operand.vmem [shape: bf16[32,64], index: 2, kind: input, shape index: {}]   ;;  %s932_s3 = inlined_call_operand.vmem [shape: bf16[16,32], index: 3, kind: input, shape index: {}]   ;;  %s933_s4 = inlined_call_operand.vmem [shape: f32[64,8], index: 4, kind: input, shape index: {}]   ;;  %s934_s5 = inlined_call_operand.hbm [shape: f32[1,256], index: 5, kind: output, shape index: {}]  }
   0x1   :  { %v44_v0 = vld [vmem:[%s929_s0 + $0x70] sm:$0xff]  ;;  %v45_v1 = vld [vmem:[%s929_s0 + $0x78] sm:$0xff]  ;;  %v42_v6 = vld [vmem:[%s929_s0 + $0x60] sm:$0xff] }
   0x2   :  { %v60_v2 = vld [vmem:[%s929_s0 + $0xf0] sm:$0xff]  ;;  %v69_v3 = vpack.c.bf16 %v45_v1, %v44_v0  ;;  %v61_v4 = vld [vmem:[%s929_s0 + $0xf8] sm:$0xff]  ;;  %v43_v7 = vld [vmem:[%s929_s0 + $0x68] sm:$0xff] }
   0x3   :  { %v77_v5 = vpack.c.bf16 %v61_v4, %v60_v2  ;;  %v58_v9 = vld [vmem:[%s929_s0 + $0xe0] sm:$0xff]  ;;  %v59_v10 = vld [vmem:[%s929_s0 + $0xe8] sm:$0xff]  ;;  %v68_v12 = vpack.c.bf16 %v43_v7, %v42_v6 }
   0x4   :  { %v181_v8 = vsel %vm146_vm0, %v69_v3, 0  ;;  %v76_v13 = vpack.c.bf16 %v59_v10, %v58_v9 }
   0x5   :  { %207 = vmatpush.bf16.xpose.msra.mxu0 %v181_v8  ;;  %v205_v11 = vsel %vm146_vm0, %v77_v5, 0 }
   0x6   :  { %236 = vmatpush.bf16.xpose.msra.mxu1 %v205_v11 }
   0x7   :  { %10 = vsyncpa [#allocation3], 0  ;;  %v178_v14 = vsel %vm146_vm0, %v68_v12, 0  ;;  %v202_v15 = vsel %vm146_vm0, %v76_v13, 0  ;;  %v40_v16 = vld [vmem:[%s929_s0 + $0x50] sm:$0xff]  ;;  %v41_v17 = vld [vmem:[%s929_s0 + $0x58] sm:$0xff] }
   0x8   :  { %v56_v18 = vld [vmem:[%s929_s0 + $0xd0] sm:$0xff]  ;;  %v57_v19 = vld [vmem:[%s929_s0 + $0xd8] sm:$0xff]  ;;  %v67_v20 = vpack.c.bf16 %v41_v17, %v40_v16  ;;  %v38_v24 = vld [vmem:[%s929_s0 + $0x40] sm:$0xff]  ;;  %v682_v39 = vmov 0   ;;  %s570_s11 = sshll.u32 %s934_s5, 4  ;;  %s571_s11 = int_to_ptr.hbm [resolvable:$true] %s570_s11 }
   0x9   :  { %v75_v21 = vpack.c.bf16 %v57_v19, %v56_v18  ;;  %v39_v25 = vld [vmem:[%s929_s0 + $0x48] sm:$0xff]  ;;  %v54_v26 = vld [vmem:[%s929_s0 + $0xc0] sm:$0xff]  ;;  %v36_v32 = vld [vmem:[%s929_s0 + $0x30] sm:$0xff]  ;;  %636 = vset.pattern.permute.xlu0 %v682_v39  ;;  %637 = vset.pattern.permute.xlu1 %v682_v39 }
   0xa   :  { %v175_v22 = vsel %vm146_vm0, %v67_v20, 0  ;;  %v55_v27 = vld [vmem:[%s929_s0 + $0xc8] sm:$0xff]  ;;  %v66_v28 = vpack.c.bf16 %v39_v25, %v38_v24  ;;  %v37_v33 = vld [vmem:[%s929_s0 + $0x38] sm:$0xff]  ;;  %v52_v34 = vld [vmem:[%s929_s0 + $0xb0] sm:$0xff]  ;;  %638 = vset.pattern.permute.xlu2 %v682_v39 }
   0xb   :  { %v199_v23 = vsel %vm146_vm0, %v75_v21, 0  ;;  %v74_v29 = vpack.c.bf16 %v55_v27, %v54_v26  ;;  %v53_v35 = vld [vmem:[%s929_s0 + $0xb8] sm:$0xff]  ;;  %v65_v36 = vpack.c.bf16 %v37_v33, %v36_v32  ;;  %v28_v37 = vld [vmem:[%s933_s4 + $0x30] sm:$0xff]  ;;  %v34_v42 = vld [vmem:[%s929_s0 + $0x20] sm:$0xff]  ;;  %v683_v32 = vmov 1  }
   0xc   :  { %v172_v30 = vsel %vm146_vm0, %v66_v28, 0  ;;  %v73_v38 = vpack.c.bf16 %v53_v35, %v52_v34  ;;  %118 = vperm.xlu0 %636, %v28_v37   ;;  %v35_v43 = vld [vmem:[%s929_s0 + $0x28] sm:$0xff]  ;;  %v50_v44 = vld [vmem:[%s929_s0 + $0xa0] sm:$0xff]  ;;  %v29_v46 = vld [vmem:[%s933_s4 + $0x38] sm:$0xff] }
   0xd   :  { %208 = vmatpush.bf16.xpose.msra.mxu0 %v178_v14  ;;  %v196_v31 = vsel %vm146_vm0, %v74_v29, 0  ;;  %v169_v40 = vsel %vm146_vm0, %v65_v36, 0  ;;  %v51_v45 = vld [vmem:[%s929_s0 + $0xa8] sm:$0xff]  ;;  %v26_v47 = vld [vmem:[%s933_s4 + $0x20] sm:$0xff]  ;;  %v64_v48 = vpack.c.bf16 %v35_v43, %v34_v42  ;;  %v32_v52 = vld [vmem:[%s929_s0 + $0x10] sm:$0xff] }
   0xe   :  { %237 = vmatpush.bf16.xpose.msra.mxu1 %v202_v15  ;;  %v193_v41 = vsel %vm146_vm0, %v73_v38, 0  ;;  %108 = vperm.xlu1 %637, %v26_v47   ;;  %v72_v49 = vpack.c.bf16 %v51_v45, %v50_v44  ;;  %v33_v53 = vld [vmem:[%s929_s0 + $0x18] sm:$0xff]  ;;  %v27_v54 = vld [vmem:[%s933_s4 + $0x28] sm:$0xff]  ;;  %v48_v55 = vld [vmem:[%s929_s0 + $0x90] sm:$0xff] }
   0xf   :  { %v166_v50 = vsel %vm146_vm0, %v64_v48, 0  ;;  %v49_v56 = vld [vmem:[%s929_s0 + $0x98] sm:$0xff]  ;;  %v829_v57 = vld [vmem:[%s933_s4] sm:$0xff]  ;;  %v63_v58 = vpack.c.bf16 %v33_v53, %v32_v52  ;;  %v31_v63 = vld [vmem:[%s929_s0 + $0x8] sm:$0xff] }
  0x10   :  { %v190_v51 = vsel %vm146_vm0, %v72_v49, 0  ;;  %v71_v59 = vpack.c.bf16 %v49_v56, %v48_v55  ;;  %v30_v62 = vld [vmem:[%s929_s0] sm:$0xff]  ;;  %v47_v1 = vld [vmem:[%s929_s0 + $0x88] sm:$0xff]  ;;  %v24_v9 = vld [vmem:[%s933_s4 + $0x10] sm:$0xff] }
  0x11   :  { %v163_v60 = vsel %vm146_vm0, %v63_v58, 0  ;;  %v46_v0 = vld [vmem:[%s929_s0 + $0x80] sm:$0xff]  ;;  %v849_v2 = vld [vmem:[%s933_s4 + $0x8] sm:$0xff]  ;;  %v62_v3 = vpack.c.bf16 %v31_v63, %v30_v62  ;;  %98 = vperm.xlu2 %638, %v24_v9   ;;  %v25_v10 = vld [vmem:[%s933_s4 + $0x18] sm:$0xff] }
  0x12   :  { %v187_v61 = vsel %vm146_vm0, %v71_v59, 0  ;;  %v70_v4 = vpack.c.bf16 %v47_v1, %v46_v0  ;;  %v623_v7 = vld [vmem:[%s930_s1] sm:$0xff]  ;;  %v624_v8 = vld [vmem:[%s930_s1 + $0x8] sm:$0xff]  ;;  %v625_v11 = vld [vmem:[%s930_s1 + $0x10] sm:$0xff] }
  0x13   :  { %v160_v5 = vsel %vm146_vm0, %v62_v3, 0  ;;  %v626_v12 = vld [vmem:[%s930_s1 + $0x18] sm:$0xff] }
  0x14   :  { %123 = vperm.xlu0 %636, %v29_v46   ;;  %v184_v6 = vsel %vm146_vm0, %v70_v4, 0 }
  0x15   :  { %209 = vmatpush.bf16.xpose.msra.mxu0 %v175_v22 }
  0x16   :  { %238 = vmatpush.bf16.xpose.msra.mxu1 %v199_v23  ;;  %113 = vperm.xlu1 %637, %v27_v54  }
  0x19   :  { %103 = vperm.xlu2 %638, %v25_v10  }
  0x1c   :  { %88 = vperm.xlu0 %636, %v829_v57  }
  0x1d   :  { %210 = vmatpush.bf16.xpose.msra.mxu0 %v172_v30 }
  0x1e   :  { %239 = vmatpush.bf16.xpose.msra.mxu1 %v196_v31  ;;  %93 = vperm.xlu1 %637, %v849_v2  }
  0x21   :  { %639 = vset.pattern.permute.xlu2 %v683_v32 }
  0x22   :  { %334 = vperm.xlu2 %639, %v24_v9  }
  0x24   :  { %640 = vset.pattern.permute.xlu0 %v683_v32 }
  0x25   :  { %211 = vmatpush.bf16.xpose.msra.mxu0 %v169_v40  ;;  %338 = vperm.xlu0 %640, %v25_v10  }
  0x26   :  { %240 = vmatpush.bf16.xpose.msra.mxu1 %v193_v41  ;;  %641 = vset.pattern.permute.xlu1 %v683_v32  ;;  %v627_v32 = vld [vmem:[%s931_s2] sm:$0xff] }
  0x27   :  { %326 = vperm.xlu1 %641, %v829_v57  }
  0x2a   :  { %330 = vperm.xlu2 %639, %v849_v2  }
  0x2d   :  { %212 = vmatpush.bf16.xpose.msra.mxu0 %v166_v50 }
  0x2e   :  { %241 = vmatpush.bf16.xpose.msra.mxu1 %v190_v51 }
  0x35   :  { %213 = vmatpush.bf16.xpose.msra.mxu0 %v163_v60 }
  0x36   :  { %242 = vmatpush.bf16.xpose.msra.mxu1 %v187_v61 }
  0x3d   :  { %214 = vmatpush.bf16.xpose.msra.mxu0 %v160_v5 }
  0x3e   :  { %243 = vmatpush.bf16.xpose.msra.mxu1 %v184_v6 }
  0x44   :  { %595 = vmatmul.msk.bf16.vlgmr.msra.gmra.mxu0 %vm146_vm0, %v623_v7 }
  0x45   :  { %599 = vmatmul.msk.bf16.vlgmr.msra.gmra.mxu1 %vm146_vm0, %v623_v7 }
  0x54   :  { %596 = vmatmul.msk.bf16.gmra.mxu0 %vm146_vm0, %v624_v8 }
  0x55   :  { %600 = vmatmul.msk.bf16.gmra.mxu1 %vm146_vm0, %v624_v8 }
  0x64   :  { %597 = vmatmul.msk.bf16.gmra.mxu0 %vm146_vm0, %v625_v11 }
  0x65   :  { %601 = vmatmul.msk.bf16.gmra.mxu1 %vm146_vm0, %v625_v11 }
  0x6b   :  { %v99_v29 = vpop.permute.xlu2 %98 }
  0x73   :  { %v104_v35 = vpop.permute.xlu2 %103 }
  0x74   :  { %598 = vmatmul.msk.bf16.gmra.mxu0 %vm146_vm0, %v626_v12 }
  0x75   :  { %602 = vmatmul.msk.bf16.gmra.mxu1 %vm146_vm0, %v626_v12 }
  0x7e   :  { %v119_v21 = vpop.permute.xlu0 %118 }
  0x80   :  { %v109_v22 = vpop.permute.xlu1 %108 }
  0x86   :  { %v124_v27 = vpop.permute.xlu0 %123 }
  0x88   :  { %v114_v28 = vpop.permute.xlu1 %113 }
  0x8e   :  { %v89_v33 = vpop.permute.xlu0 %88 }
  0x90   :  { %v94_v34 = vpop.permute.xlu1 %93 }
  0xc1   :  { %v216_v13 = vpop.f32.mrf.mxu0 }
  0xc2   :  { %v880_v14 = vpop.f32.mrf.mxu1  ;;  %v885_v39 = vadd.f32 %v216_v13, %v89_v33 }
  0xc3   :  { %v246_v9 = vadd.f32 %v880_v14, %v89_v33  ;;  %v628_v33 = vld [vmem:[%s931_s2 + $0x8] sm:$0xff] }
  0xc4   :  { %v281_v14 = vmul.f32 0.01, %v885_v39  ;;  %vm265_vm15 = vcmp.gt.f32.partialorder %v885_v39, 0.0 }
  0xc9   :  { %v218_v15 = vpop.f32.mrf.mxu0 }
  0xca   :  { %v882_v16 = vpop.f32.mrf.mxu1  ;;  %v887_v40 = vadd.f32 %v218_v15, %v94_v34 }
  0xcb   :  { %v248_v6 = vadd.f32 %v882_v16, %v94_v34 }
  0xcc   :  { %vm267_vm13 = vcmp.gt.f32.partialorder %v887_v40, 0.0 }
  0xcd   :  { %vm268_vm14 = vcmp.gt.f32.partialorder %v248_v6, 0.0 }
  0xd1   :  { %v221_v17 = vpop.f32.mrf.mxu0 }
  0xd2   :  { %v250_v18 = vpop.f32.mrf.mxu1  ;;  %v222_v42 = vadd.f32 %v221_v17, %v99_v29  ;;  %v283_v17 = vmul.f32 0.01, %v887_v40 }
  0xd3   :  { %v889_v43 = vadd.f32 %v250_v18, %v99_v29 }
  0xd4   :  { %v285_v10 = vmul.f32 0.01, %v222_v42  ;;  %vm269_vm11 = vcmp.gt.f32.partialorder %v222_v42, 0.0 }
  0xd5   :  { %v286_v12 = vmul.f32 0.01, %v889_v43  ;;  %vm270_vm12 = vcmp.gt.f32.partialorder %v889_v43, 0.0 }
  0xd9   :  { %v223_v19 = vpop.f32.mrf.mxu0 }
  0xda   :  { %v252_v20 = vpop.f32.mrf.mxu1  ;;  %v224_v44 = vadd.f32 %v223_v19, %v104_v35  ;;  %v284_v19 = vmul.f32 0.01, %v248_v6 }
  0xdb   :  { %v253_v47 = vadd.f32 %v252_v20, %v104_v35 }
  0xdc   :  { %v287_v3 = vmul.f32 0.01, %v224_v44  ;;  %vm271_vm9 = vcmp.gt.f32.partialorder %v224_v44, 0.0 }
  0xdd   :  { %v288_v7 = vmul.f32 0.01, %v253_v47  ;;  %vm272_vm10 = vcmp.gt.f32.partialorder %v253_v47, 0.0 }
  0xde   :  { %v303_v16 = vsel %vm271_vm9, %v224_v44, %v287_v3  ;;  %v327_v44 = vpop.permute.xlu1 %326 }
  0xdf   :  { %v304_v20 = vsel %vm272_vm10, %v253_v47, %v288_v7 }
  0xe1   :  { %v226_v23 = vpop.f32.mrf.mxu0 }
  0xe2   :  { %v255_v24 = vpop.f32.mrf.mxu1  ;;  %v227_v37 = vadd.f32 %v226_v23, %v109_v22 }
  0xe3   :  { %v256_v48 = vadd.f32 %v255_v24, %v109_v22  ;;  %v282_v22 = vmul.f32 0.01, %v246_v9  ;;  %v302_v24 = vsel %vm270_vm12, %v889_v43, %v286_v12  ;;  %v686_v43 = vmov 3  }
  0xe4   :  { %v289_v52 = vmul.f32 0.01, %v227_v37  ;;  %vm273_vm6 = vcmp.gt.f32.partialorder %v227_v37, 0.0 }
  0xe5   :  { %v290_v62 = vmul.f32 0.01, %v256_v48  ;;  %vm274_vm8 = vcmp.gt.f32.partialorder %v256_v48, 0.0 }
  0xe6   :  { %v305_v11 = vsel %vm273_vm6, %v227_v37, %v289_v52 }
  0xe7   :  { %v306_v15 = vsel %vm274_vm8, %v256_v48, %v290_v62 }
  0xe9   :  { %v228_v25 = vpop.f32.mrf.mxu0 }
  0xea   :  { %v257_v26 = vpop.f32.mrf.mxu1  ;;  %v229_v41 = vadd.f32 %v228_v25, %v114_v28  ;;  %v320_v25 = vpack.c.bf16 %v304_v20, %v302_v24 }
  0xeb   :  { %v258_v45 = vadd.f32 %v257_v26, %v114_v28  ;;  %v299_v26 = vsel %vm267_vm13, %v887_v40, %v283_v17  ;;  %v297_v28 = vsel %vm265_vm15, %v885_v39, %v281_v14  ;;  %v685_v39 = vmov 4   ;;  %v335_v40 = vpop.permute.xlu2 %334 }
  0xec   :  { %v291_v55 = vmul.f32 0.01, %v229_v41  ;;  %vm275_vm5 = vcmp.gt.f32.partialorder %v229_v41, 0.0  ;;  %v317_v29 = vpack.c.bf16 %v299_v26, %v297_v28  ;;  %644 = vset.pattern.permute.xlu0 %v685_v39 }
  0xed   :  { %v292_v58 = vmul.f32 0.01, %v258_v45  ;;  %vm276_vm7 = vcmp.gt.f32.partialorder %v258_v45, 0.0  ;;  %483 = vperm.xlu0 %644, %v829_v57  }
  0xee   :  { %v307_v5 = vsel %vm275_vm5, %v229_v41, %v291_v55 }
  0xef   :  { %v308_v8 = vsel %vm276_vm7, %v258_v45, %v292_v58  ;;  %v321_v13 = vpack.c.bf16 %v307_v5, %v305_v11 }
  0xf0   :  { %v322_v18 = vpack.c.bf16 %v308_v8, %v306_v15 }
  0xf1   :  { %v231_v30 = vpop.f32.mrf.mxu0 }
  0xf2   :  { %v260_v31 = vpop.f32.mrf.mxu1  ;;  %v232_v36 = vadd.f32 %v231_v30, %v119_v21 }
  0xf3   :  { %v261_v38 = vadd.f32 %v260_v31, %v119_v21  ;;  %v301_v21 = vsel %vm269_vm11, %v222_v42, %v285_v10  ;;  %v331_v45 = vpop.permute.xlu2 %330 }
  0xf4   :  { %v293_v49 = vmul.f32 0.01, %v232_v36  ;;  %vm277_vm1 = vcmp.gt.f32.partialorder %v232_v36, 0.0  ;;  %v319_v23 = vpack.c.bf16 %v303_v16, %v301_v21 }
  0xf5   :  { %v294_v53 = vmul.f32 0.01, %v261_v38  ;;  %vm278_vm3 = vcmp.gt.f32.partialorder %v261_v38, 0.0  ;;  %647 = vset.pattern.permute.xlu0 %v686_v43 }
  0xf6   :  { %v309_v60 = vsel %vm277_vm1, %v232_v36, %v293_v49  ;;  %vm266_vm1 = vcmp.gt.f32.partialorder %v246_v9, 0.0  ;;  %v339_v49 = vpop.permute.xlu0 %338 }
  0xf7   :  { %v310_v0 = vsel %vm278_vm3, %v261_v38, %v294_v53  ;;  %v298_v30 = vsel %vm266_vm1, %v246_v9, %v282_v22  ;;  %v684_v38 = vmov 2  }
  0xf8   :  { %642 = vset.pattern.permute.xlu1 %v684_v38  ;;  %643 = vset.pattern.permute.xlu2 %v684_v38 }
  0xf9   :  { %v233_v46 = vpop.f32.mrf.mxu0  ;;  %427 = vperm.xlu1 %642, %v829_v57   ;;  %431 = vperm.xlu2 %643, %v849_v2  }
  0xfa   :  { %v234_v50 = vadd.f32 %v233_v46, %v124_v27  ;;  %v262_v51 = vpop.f32.mrf.mxu1 }
  0xfb   :  { %v263_v54 = vadd.f32 %v262_v51, %v124_v27  ;;  %v300_v27 = vsel %vm268_vm14, %v248_v6, %v284_v19 }
  0xfc   :  { %v295_v56 = vmul.f32 0.01, %v234_v50  ;;  %vm279_vm2 = vcmp.gt.f32.partialorder %v234_v50, 0.0  ;;  %v318_v31 = vpack.c.bf16 %v300_v27, %v298_v30 }
  0xfd   :  { %v296_v59 = vmul.f32 0.01, %v263_v54  ;;  %vm280_vm4 = vcmp.gt.f32.partialorder %v263_v54, 0.0 }
  0xfe   :  { %v311_v61 = vsel %vm279_vm2, %v234_v50, %v295_v56  ;;  %vm351_vm2 = vcmask 523264  }
  0xff   :  { %v323_v63 = vpack.c.bf16 %v311_v61, %v309_v60  ;;  %v312_v1 = vsel %vm280_vm4, %v263_v54, %v296_v59 }
 0x100   :  { %v324_v4 = vpack.c.bf16 %v312_v1, %v310_v0 }
 0x101   :  { %362 = vmatpush.bf16.msra.mxu2 %v323_v63  ;;  %645 = vset.pattern.permute.xlu1 %v685_v39 }
 0x102   :  { %381 = vmatpush.bf16.msra.mxu3 %v324_v4  ;;  %487 = vperm.xlu1 %645, %v849_v2  }
 0x103   :  { %646 = vset.pattern.permute.xlu2 %v686_v43 }
 0x104   :  { %509 = vperm.xlu2 %646, %v829_v57  }
 0x105   :  { %363 = vmatpush.bf16.msra.mxu2 %v321_v13  ;;  %v629_v13 = vld [vmem:[%s932_s3] sm:$0xff]  ;;  %s687_s3 = smov [#allocation2]  }
 0x106   :  { %382 = vmatpush.bf16.msra.mxu3 %v322_v18  ;;  %s568_s8 = sshll.u32 %s687_s3, 4  ;;  %s569_s8 = int_to_ptr.vmem [resolvable:$true] %s568_s8 }
 0x109   :  { %364 = vmatpush.bf16.msra.mxu2 %v319_v23 }
 0x10a   :  { %383 = vmatpush.bf16.msra.mxu3 %v320_v25 }
 0x10d   :  { %365 = vmatpush.bf16.msra.mxu2 %v317_v29 }
 0x10e   :  { %384 = vmatpush.bf16.msra.mxu3 %v318_v31 }
 0x110   :  { %611 = vmatmul.msk.bf16.vlgmr.msra.gmra.mxu2 %vm351_vm2, %v627_v32 }
 0x111   :  { %613 = vmatmul.msk.bf16.vlgmr.msra.gmra.mxu3 %vm351_vm2, %v627_v32 }
 0x120   :  { %612 = vmatmul.msk.bf16.gmra.mxu2 %vm351_vm2, %v628_v33 }
 0x121   :  { %614 = vmatmul.msk.bf16.gmra.mxu3 %vm351_vm2, %v628_v33 }
 0x153   :  { %v432_v20 = vpop.permute.xlu2 %431 }
 0x15f   :  { %v484_v29 = vpop.permute.xlu0 %483 }
 0x16b   :  { %v428_v17 = vpop.permute.xlu1 %427 }
 0x174   :  { %v488_v27 = vpop.permute.xlu1 %487 }
 0x193   :  { %v367_v34 = vpop.f32.mrf.mxu2 }
 0x194   :  { %v386_v35 = vpop.f32.mrf.mxu3  ;;  %v368_v47 = vadd.f32 %v367_v34, %v327_v44 }
 0x195   :  { %v387_v53 = vadd.f32 %v386_v35, %v327_v44 }
 0x196   :  { %v404_v58 = vmul.f32 0.01, %v368_v47  ;;  %vm396_vm8 = vcmp.gt.f32.partialorder %v368_v47, 0.0 }
 0x197   :  { %v405_v1 = vmul.f32 0.01, %v387_v53  ;;  %vm397_vm10 = vcmp.gt.f32.partialorder %v387_v53, 0.0 }
 0x198   :  { %v412_v9 = vsel %vm396_vm8, %v368_v47, %v404_v58 }
 0x199   :  { %v413_v11 = vsel %vm397_vm10, %v387_v53, %v405_v1 }
 0x19b   :  { %v369_v36 = vpop.f32.mrf.mxu2 }
 0x19c   :  { %v388_v37 = vpop.f32.mrf.mxu3  ;;  %v370_v50 = vadd.f32 %v369_v36, %v331_v45 }
 0x19d   :  { %v389_v51 = vadd.f32 %v388_v37, %v331_v45 }
 0x19e   :  { %v406_v2 = vmul.f32 0.01, %v370_v50  ;;  %vm398_vm7 = vcmp.gt.f32.partialorder %v370_v50, 0.0 }
 0x19f   :  { %v407_v62 = vmul.f32 0.01, %v389_v51  ;;  %vm399_vm9 = vcmp.gt.f32.partialorder %v389_v51, 0.0 }
 0x1a0   :  { %v414_v7 = vsel %vm398_vm7, %v370_v50, %v406_v2 }
 0x1a1   :  { %v415_v8 = vsel %vm399_vm9, %v389_v51, %v407_v62  ;;  %v422_v10 = vpack.c.bf16 %v414_v7, %v412_v9 }
 0x1a2   :  { %v423_v12 = vpack.c.bf16 %v415_v8, %v413_v11 }
 0x1a3   :  { %v372_v41 = vpop.f32.mrf.mxu2 }
 0x1a4   :  { %v391_v42 = vpop.f32.mrf.mxu3  ;;  %v373_v46 = vadd.f32 %v372_v41, %v335_v40 }
 0x1a5   :  { %v392_v48 = vadd.f32 %v391_v42, %v335_v40 }
 0x1a6   :  { %v408_v54 = vmul.f32 0.01, %v373_v46  ;;  %vm400_vm3 = vcmp.gt.f32.partialorder %v373_v46, 0.0 }
 0x1a7   :  { %v409_v59 = vmul.f32 0.01, %v392_v48  ;;  %vm401_vm5 = vcmp.gt.f32.partialorder %v392_v48, 0.0 }
 0x1a8   :  { %v416_v63 = vsel %vm400_vm3, %v373_v46, %v408_v54 }
 0x1a9   :  { %v417_v4 = vsel %vm401_vm5, %v392_v48, %v409_v59 }
 0x1ab   :  { %v374_v52 = vpop.f32.mrf.mxu2 }
 0x1ac   :  { %v393_v55 = vpop.f32.mrf.mxu3  ;;  %v375_v56 = vadd.f32 %v374_v52, %v339_v49 }
 0x1ad   :  { %v394_v60 = vadd.f32 %v393_v55, %v339_v49  ;;  %v510_v49 = vpop.permute.xlu2 %509 }
 0x1ae   :  { %v410_v61 = vmul.f32 0.01, %v375_v56  ;;  %vm402_vm4 = vcmp.gt.f32.partialorder %v375_v56, 0.0 }
 0x1af   :  { %v411_v57 = vmul.f32 0.01, %v394_v60  ;;  %vm403_vm6 = vcmp.gt.f32.partialorder %v394_v60, 0.0 }
 0x1b0   :  { %v418_v0 = vsel %vm402_vm4, %v375_v56, %v410_v61 }
 0x1b1   :  { %v424_v3 = vpack.c.bf16 %v418_v0, %v416_v63  ;;  %v419_v5 = vsel %vm403_vm6, %v394_v60, %v411_v57  ;;  %vm555_vm6 = vcmask 1040384  }
 0x1b2   :  { %v425_v6 = vpack.c.bf16 %v419_v5, %v417_v4 }
 0x1b3   :  { %448 = vmatpush.bf16.msrb.mxu2 %v424_v3 }
 0x1b4   :  { %462 = vmatpush.bf16.msrb.mxu3 %v425_v6 }
 0x1b7   :  { %449 = vmatpush.bf16.msrb.mxu2 %v422_v10 }
 0x1b8   :  { %463 = vmatpush.bf16.msrb.mxu3 %v423_v12  ;;  %v558_v12 = vlaneseq }
 0x1ba   :  { %619 = vmatmul.msk.bf16.vlgmr.msrb.gmra.mxu2 %vm146_vm0, %v629_v13  ;;  %vm560_vm8 = vcmp.lt.s32.totalorder %v558_v12, 256 }
 0x1bb   :  { %620 = vmatmul.msk.bf16.vlgmr.msrb.gmra.mxu3 %vm146_vm0, %v629_v13 }
 0x23d   :  { %v451_v15 = vpop.f32.mrf.mxu2 }
 0x23e   :  { %v465_v18 = vpop.f32.mrf.mxu3  ;;  %v452_v16 = vadd.f32 %v451_v15, %v428_v17 }
 0x23f   :  { %v466_v19 = vadd.f32 %v465_v18, %v428_v17 }
 0x240   :  { %v474_v14 = vmul.f32 0.01, %v452_v16  ;;  %vm470_vm11 = vcmp.gt.f32.partialorder %v452_v16, 0.0 }
 0x241   :  { %v475_v22 = vmul.f32 0.01, %v466_v19  ;;  %vm471_vm12 = vcmp.gt.f32.partialorder %v466_v19, 0.0 }
 0x242   :  { %v478_v28 = vsel %vm470_vm11, %v452_v16, %v474_v14 }
 0x243   :  { %v479_v31 = vsel %vm471_vm12, %v466_v19, %v475_v22  ;;  %v490_v35 = vmul.f32 %v484_v29, %v478_v28 }
 0x244   :  { %v491_v37 = vmul.f32 %v484_v29, %v479_v31 }
 0x245   :  { %v453_v21 = vpop.f32.mrf.mxu2 }
 0x246   :  { %v454_v23 = vadd.f32 %v453_v21, %v432_v20  ;;  %v467_v24 = vpop.f32.mrf.mxu3 }
 0x247   :  { %v468_v25 = vadd.f32 %v467_v24, %v432_v20 }
 0x248   :  { %v476_v26 = vmul.f32 0.01, %v454_v23  ;;  %vm472_vm13 = vcmp.gt.f32.partialorder %v454_v23, 0.0 }
 0x249   :  { %v477_v30 = vmul.f32 0.01, %v468_v25  ;;  %vm473_vm0 = vcmp.gt.f32.partialorder %v468_v25, 0.0 }
 0x24a   :  { %v480_v32 = vsel %vm472_vm13, %v454_v23, %v476_v26 }
 0x24b   :  { %v481_v33 = vsel %vm473_vm0, %v468_v25, %v477_v30  ;;  %v492_v34 = vmul.f32 %v488_v27, %v480_v32 }
 0x24c   :  { %v493_v36 = vmul.f32 %v488_v27, %v481_v33 }
 0x24d   :  { %v494_v38 = vadd.f32 %v492_v34, %v490_v35 }
 0x24e   :  { %v501_v39 = vadd.f32 %v493_v36, %v491_v37 }
 0x24f   :  { %v495_v40 = vrot.slane %v494_v38, 4 }
 0x250   :  { %v502_v41 = vrot.slane %v501_v39, 4 }
 0x251   :  { %v496_v42 = vadd.f32 %v495_v40, %v494_v38 }
 0x252   :  { %v503_v43 = vadd.f32 %v502_v41, %v501_v39 }
 0x253   :  { %v497_v44 = vrot.slane %v496_v42, 2 }
 0x254   :  { %v504_v45 = vrot.slane %v503_v43, 2 }
 0x255   :  { %v498_v46 = vadd.f32 %v497_v44, %v496_v42 }
 0x256   :  { %v505_v47 = vadd.f32 %v504_v45, %v503_v43 }
 0x257   :  { %v499_v48 = vrot.slane %v498_v46, 1 }
 0x258   :  { %v506_v50 = vrot.slane %v505_v47, 1 }
 0x259   :  { %v500_v51 = vadd.f32 %v499_v48, %v498_v46 }
 0x25a   :  { %v507_v52 = vadd.f32 %v506_v50, %v505_v47 }
 0x25b   :  { %v512_v53 = vadd.f32 %v510_v49, %v500_v51 }
 0x25c   :  { %v513_v54 = vadd.f32 %v510_v49, %v507_v52 }
 0x25d   :  { %v621_v55 = vmul.f32 -1.442695, %v512_v53 }
 0x25e   :  { %v622_v56 = vmul.f32 -1.442695, %v513_v54 }
 0x25f   :  { %648 = vpow2.f32 %v621_v55 }
 0x260   :  { %650 = vpow2.f32 %v622_v56 }
 0x265   :  { %v649_v58 = vpop.eup %648 }
 0x266   :  { %v651_v59 = vpop.eup %650  ;;  %v520_v60 = vadd.f32 1.0, %v649_v58 }
 0x267   :  { %v521_v2 = vadd.f32 1.0, %v651_v59 }
 0x268   :  { %652 = vrcp.f32 %v520_v60  ;;  %vm527_vm1 = vweird.f32 %v520_v60  ;;  %v533_v8 = vand.u32 2147483648, %v520_v60  ;;  %v531_v10 = vand.u32 2147483647, %v520_v60 }
 0x269   :  { %654 = vrcp.f32 %v521_v2  ;;  %v548_v4 = vand.u32 2147483648, %v521_v2  ;;  %v546_v6 = vand.u32 2147483647, %v521_v2  ;;  %vm542_vm3 = vweird.f32 %v521_v2 }
 0x26a   :  { %v534_v18 = vor.u32 1.1754944e-38, %v533_v8  ;;  %vm532_vm7 = vcmp.eq.f32.partialorder %v531_v10, 8.507059e+37 }
 0x26b   :  { %v549_v13 = vor.u32 1.1754944e-38, %v548_v4  ;;  %vm547_vm5 = vcmp.eq.f32.partialorder %v546_v6, 8.507059e+37 }
 0x26e   :  { %v653_v61 = vpop.eup %652 }
 0x26f   :  { %v655_v62 = vpop.eup %654  ;;  %v523_v57 = vmul.f32 %v653_v61, %v520_v60  ;;  %vm528_vm14 = vweird.f32 %v653_v61 }
 0x270   :  { %v538_v63 = vmul.f32 %v655_v62, %v521_v2  ;;  %vm543_vm15 = vweird.f32 %v655_v62  ;;  %vm920_vm2 = vmor %vm527_vm1, %vm528_vm14 }
 0x271   :  { %v524_v0 = vsub.f32 1.0, %v523_v57  ;;  %vm544_vm4 = vmor %vm542_vm3, %vm543_vm15 }
 0x272   :  { %v539_v1 = vsub.f32 1.0, %v538_v63 }
 0x273   :  { %v525_v3 = vmul.f32 %v653_v61, %v524_v0 }
 0x274   :  { %v540_v5 = vmul.f32 %v655_v62, %v539_v1 }
 0x275   :  { %v526_v7 = vadd.f32 %v653_v61, %v525_v3 }
 0x276   :  { %v541_v11 = vadd.f32 %v655_v62, %v540_v5 }
 0x277   :  { %v530_v15 = vsel %vm920_vm2, %v653_v61, %v526_v7 }
 0x278   :  { %v545_v17 = vsel %vm544_vm4, %v655_v62, %v541_v11  ;;  %v535_v20 = vsel %vm532_vm7, %v534_v18, %v530_v15 }
 0x279   :  { %v550_v16 = vsel %vm547_vm5, %v549_v13, %v545_v17 }
 0x27a   :  { %v554_v19 = vrot.slane %v550_v16, 7 }
 0x27c   :  { %v556_v14 = vsel %vm555_vm6, %v535_v20, %v554_v19 }
 0x27d   :  { %562 = vst.msk [vmem:[#allocation2] sm:$0x3] %vm560_vm8, %v556_v14 }
 0x27e   :  { %573 = dma.vmem_to_hbm [thread:$0]  %s569_s8, 32, %s571_s11, [#allocation3]  }
 0x27f   :  { %680 = dma.done.wait [#allocation3], 32  }
 0x280   :  { %681 = vsyncadd [#allocation3], 4294967264 }
 0x281   :  { %578 = vsyncpa [#allocation3], 1 }

</bundles_post_ra>
